<compile_context>
chip_gen: v7x
topology: tpu7x:2x2x1
jax: 0.10.0
libtpu: 0.0.40
codegen_flags: <defaults>
</compile_context>

<pallas_src>
import functools

import jax
import jax.numpy as jnp
from jax.experimental import pallas as pl
from jax.experimental.pallas import tpu as pltpu

IN_FEATURES = 1537
HIDDEN = 50
OUT_FEATURES = 1
DEFAULT_TB = 1024   # max batch tile; safe on v7x (64 MiB VMEM), good on v5e/v6e


def _round_up(n, m):
    return ((n + m - 1) // m) * m


def _mlp_kernel(x_ref, w1_ref, b1_ref, w2_ref, b2_ref, w3_ref, b3_ref, o_ref):
    # Layer 1: bf16 (TB, 1537) @ bf16 (1537, 50) with f32 MXU accumulation.
    h1 = jnp.dot(x_ref[...], w1_ref[...], preferred_element_type=jnp.float32)
    h1 = jnp.maximum(h1 + b1_ref[...], 0.0)
    # Layer 2: f32 (TB, 50) @ (50, 50)
    h2 = jnp.dot(h1, w2_ref[...], preferred_element_type=jnp.float32)
    h2 = jnp.maximum(h2 + b2_ref[...], 0.0)
    # Predict: (TB, 50) @ (50, 1)
    out = jnp.dot(h2, w3_ref[...], preferred_element_type=jnp.float32)
    o_ref[...] = out + b3_ref[...]


@functools.partial(jax.jit, static_argnames=("tb",))
def mlp_regression_rel(x, params, tb=DEFAULT_TB):
    """Forward pass of MLPregressionRel.

    x: (B, 1537) float (any float dtype; streamed to the kernel as bf16)
    returns: (B,) float32  (equivalent to `output[:, 0]` in the PyTorch module)
    """
    w1, b1, w2, b2, w3, b3 = params
    B = x.shape[0]

    # Balanced batch tiles; aim for >= 2 grid steps (v7x megacore) when the
    # batch can be split, with the per-tile pad waste bounded to < 16 rows.
    num_tiles_target = max(2, pl.cdiv(B, tb))
    TB = _round_up(pl.cdiv(B, num_tiles_target), 16)
    if TB >= B:
        TB = B  # single full-dim block (always a legal block shape)
    num_tiles = pl.cdiv(B, TB)

    # Stream layer-1 operands as bf16 (no-op if the caller already passes bf16).
    x_bf16 = x.astype(jnp.bfloat16)
    w1_bf16 = w1.astype(jnp.bfloat16)

    # Weights/biases: full-array blocks with constant index_maps (VMEM-resident).
    const_spec = lambda a: pl.BlockSpec(a.shape, lambda i: (0,) * a.ndim)

    # VMEM budget: double-buffered bf16 x tile dominates; weights < 0.2 MiB.
    x_tile_bytes = TB * IN_FEATURES * 2
    out_tile_bytes = TB * OUT_FEATURES * 4
    weight_bytes = (IN_FEATURES * HIDDEN * 2
                    + (HIDDEN * HIDDEN + HIDDEN * OUT_FEATURES
                       + 2 * HIDDEN + OUT_FEATURES) * 4)
    vmem_limit = min(2 * x_tile_bytes + 2 * out_tile_bytes + weight_bytes
                     + (4 << 20), 48 << 20)

    flops = 2 * B * (IN_FEATURES * HIDDEN + HIDDEN * HIDDEN
                     + HIDDEN * OUT_FEATURES)
    bytes_accessed = (B * IN_FEATURES * 2 + B * OUT_FEATURES * 4
                      + weight_bytes)

    out = pl.pallas_call(
        _mlp_kernel,
        out_shape=jax.ShapeDtypeStruct((B, OUT_FEATURES), jnp.float32),
        grid_spec=pltpu.PrefetchScalarGridSpec(
            num_scalar_prefetch=0,
            grid=(num_tiles,),
            in_specs=[
                pl.BlockSpec((TB, IN_FEATURES), lambda i: (i, 0)),  # x stream
                const_spec(w1_bf16),
                const_spec(b1),
                const_spec(w2),
                const_spec(b2),
                const_spec(w3),
                const_spec(b3),
            ],
            out_specs=pl.BlockSpec((TB, OUT_FEATURES), lambda i: (i, 0)),
        ),
        compiler_params=pltpu.CompilerParams(
            dimension_semantics=("parallel",),
            vmem_limit_bytes=vmem_limit,
        ),
        cost_estimate=pl.CostEstimate(
            flops=flops, transcendentals=0, bytes_accessed=bytes_accessed),
    )(x_bf16, w1_bf16, b1, w2, b2, w3, b3)
    return out[:, 0]


def init_params(key):
    """Deterministic init mimicking PyTorch nn.Linear default (uniform +/- 1/sqrt(fan_in))."""
    ks = jax.random.split(key, 6)

    def linear(kw, kb, fan_in, fan_out):
        bound = 1.0 / jnp.sqrt(jnp.float32(fan_in))
        w = jax.random.uniform(kw, (fan_in, fan_out), jnp.float32, -bound, bound)
        b = jax.random.uniform(kb, (1, fan_out), jnp.float32, -bound, bound)
        return w, b

    w1, b1 = linear(ks[0], ks[1], IN_FEATURES, HIDDEN)
    w2, b2 = linear(ks[2], ks[3], HIDDEN, HIDDEN)
    w3, b3 = linear(ks[4], ks[5], HIDDEN, OUT_FEATURES)
    return (w1, b1, w2, b2, w3, b3)


def reference(x, params):
    w1, b1, w2, b2, w3, b3 = params
    h1 = jnp.maximum(x @ w1 + b1, 0.0)
    h2 = jnp.maximum(h1 @ w2 + b2, 0.0)
    return (h2 @ w3 + b3)[:, 0]


if __name__ == "__main__":
    key = jax.random.PRNGKey(0)
    k_params, k_x1, k_x2 = jax.random.split(key, 3)
    params = init_params(k_params)

    # Small case: single full-dim batch block.
    B1 = 8
    x1 = jax.random.normal(k_x1, (B1, IN_FEATURES), dtype=jnp.float32)
    y1 = jax.block_until_ready(mlp_regression_rel(x1, params))
    y1_ref = jax.block_until_ready(reference(x1, params))
    assert y1.shape == (B1,), y1.shape
    # bf16 streaming of x/w1 (f32 accumulation) -> relaxed tolerance.
    assert jnp.allclose(y1, y1_ref, atol=2e-2, rtol=2e-2), (y1, y1_ref)

    # Non-multiple-of-16 batch: exercises the two-tile / ragged-last-block path.
    B2 = 20
    x2 = jax.random.normal(k_x2, (B2, IN_FEATURES), dtype=jnp.float32)
    y2 = jax.block_until_ready(mlp_regression_rel(x2, params))
    y2_ref = jax.block_until_ready(reference(x2, params))
    assert y2.shape == (B2,), y2.shape
    assert jnp.allclose(y2, y2_ref, atol=2e-2, rtol=2e-2), (y2, y2_ref)

    print("KERNEL_OK")
</pallas_src>

<mosaic_0001>
module attributes {stable_mosaic.version = 11 : i64} {
  func.func @_mlp_kernel(%arg0: i32, %arg1: memref<8x1537xbf16, #tpu.memory_space<vmem>>, %arg2: memref<1537x50xbf16, #tpu.memory_space<vmem>>, %arg3: memref<1x50xf32, #tpu.memory_space<vmem>>, %arg4: memref<50x50xf32, #tpu.memory_space<vmem>>, %arg5: memref<1x50xf32, #tpu.memory_space<vmem>>, %arg6: memref<50x1xf32, #tpu.memory_space<vmem>>, %arg7: memref<1x1xf32, #tpu.memory_space<vmem>>, %arg8: memref<8x1xf32, #tpu.memory_space<vmem>>) attributes {dimension_semantics = [#tpu.dimension_semantics<parallel>], iteration_bounds = array<i64: 1>, scalar_prefetch = 0 : i64, scratch_operands = 0 : i64, tpu.core_type = #tpu.core_type<tc>, window_params = [{transform_indices = @transform_0, window_bounds = array<i64: 8, 1537>}, {pipeline_mode = #tpu.pipeline_mode<synchronous>, transform_indices = @transform_1, window_bounds = array<i64: 1537, 50>}, {pipeline_mode = #tpu.pipeline_mode<synchronous>, transform_indices = @transform_2, window_bounds = array<i64: 1, 50>}, {pipeline_mode = #tpu.pipeline_mode<synchronous>, transform_indices = @transform_3, window_bounds = array<i64: 50, 50>}, {pipeline_mode = #tpu.pipeline_mode<synchronous>, transform_indices = @transform_4, window_bounds = array<i64: 1, 50>}, {pipeline_mode = #tpu.pipeline_mode<synchronous>, transform_indices = @transform_5, window_bounds = array<i64: 50, 1>}, {pipeline_mode = #tpu.pipeline_mode<synchronous>, transform_indices = @transform_6, window_bounds = array<i64: 1, 1>}, {transform_indices = @transform_7, window_bounds = array<i64: 8, 1>}]} {
    %c0 = arith.constant 0 : index
    %c0_0 = arith.constant 0 : index
    %0 = vector.load %arg1[%c0, %c0_0] : memref<8x1537xbf16, #tpu.memory_space<vmem>>, vector<8x1537xbf16>
    %c0_1 = arith.constant 0 : index
    %c0_2 = arith.constant 0 : index
    %1 = vector.load %arg2[%c0_1, %c0_2] : memref<1537x50xbf16, #tpu.memory_space<vmem>>, vector<1537x50xbf16>
    %cst = arith.constant dense<0.000000e+00> : vector<8x50xf32>
    %2 = tpu.matmul %0, %1, %cst {dimension_numbers = #tpu.dot_dimension_numbers<[1], [0], [0], [1], [0, 0, 1, 1], [], []>} : vector<8x1537xbf16>, vector<1537x50xbf16>, vector<8x50xf32> -> vector<8x50xf32>
    %c0_3 = arith.constant 0 : index
    %c0_4 = arith.constant 0 : index
    %3 = vector.load %arg3[%c0_3, %c0_4] : memref<1x50xf32, #tpu.memory_space<vmem>>, vector<1x50xf32>
    %4 = vector.broadcast %3 : vector<1x50xf32> to vector<8x50xf32>
    %5 = arith.addf %2, %4 : vector<8x50xf32>
    %cst_5 = arith.constant 0.000000e+00 : f32
    %6 = vector.broadcast %cst_5 : f32 to vector<8x50xf32>
    %7 = arith.maximumf %5, %6 : vector<8x50xf32>
    %c0_6 = arith.constant 0 : index
    %c0_7 = arith.constant 0 : index
    %8 = vector.load %arg4[%c0_6, %c0_7] : memref<50x50xf32, #tpu.memory_space<vmem>>, vector<50x50xf32>
    %cst_8 = arith.constant dense<0.000000e+00> : vector<8x50xf32>
    %9 = tpu.matmul %7, %8, %cst_8 {dimension_numbers = #tpu.dot_dimension_numbers<[1], [0], [0], [1], [0, 0, 1, 1], [], []>} : vector<8x50xf32>, vector<50x50xf32>, vector<8x50xf32> -> vector<8x50xf32>
    %c0_9 = arith.constant 0 : index
    %c0_10 = arith.constant 0 : index
    %10 = vector.load %arg5[%c0_9, %c0_10] : memref<1x50xf32, #tpu.memory_space<vmem>>, vector<1x50xf32>
    %11 = vector.broadcast %10 : vector<1x50xf32> to vector<8x50xf32>
    %12 = arith.addf %9, %11 : vector<8x50xf32>
    %cst_11 = arith.constant 0.000000e+00 : f32
    %13 = vector.broadcast %cst_11 : f32 to vector<8x50xf32>
    %14 = arith.maximumf %12, %13 : vector<8x50xf32>
    %c0_12 = arith.constant 0 : index
    %c0_13 = arith.constant 0 : index
    %15 = vector.load %arg6[%c0_12, %c0_13] : memref<50x1xf32, #tpu.memory_space<vmem>>, vector<50x1xf32>
    %cst_14 = arith.constant dense<0.000000e+00> : vector<8x1xf32>
    %16 = tpu.matmul %14, %15, %cst_14 {dimension_numbers = #tpu.dot_dimension_numbers<[1], [0], [0], [1], [0, 0, 1, 1], [], []>} : vector<8x50xf32>, vector<50x1xf32>, vector<8x1xf32> -> vector<8x1xf32>
    %c0_15 = arith.constant 0 : index
    %c0_16 = arith.constant 0 : index
    %17 = vector.load %arg7[%c0_15, %c0_16] : memref<1x1xf32, #tpu.memory_space<vmem>>, vector<1x1xf32>
    %18 = vector.broadcast %17 : vector<1x1xf32> to vector<8x1xf32>
    %19 = arith.addf %16, %18 : vector<8x1xf32>
    %c0_17 = arith.constant 0 : index
    %c0_18 = arith.constant 0 : index
    %20 = vector.load %arg8[%c0_17, %c0_18] : memref<8x1xf32, #tpu.memory_space<vmem>>, vector<8x1xf32>
    tpu.vector_store %arg8[%c0_17, %c0_18], %19 {strides = array<i32>} : memref<8x1xf32, #tpu.memory_space<vmem>>, vector<8x1xf32>,
    return
  }
  func.func @transform_0(%arg0: i32) -> (i32, i32) {
    %c0_i32 = arith.constant 0 : i32
    %c0_i32_0 = arith.constant 0 : i32
    return %arg0, %c0_i32 : i32, i32
  }
  func.func @transform_1(%arg0: i32) -> (i32, i32) {
    %c0_i32 = arith.constant 0 : i32
    %c0_i32_0 = arith.constant 0 : i32
    %c0_i32_1 = arith.constant 0 : i32
    return %c0_i32, %c0_i32_0 : i32, i32
  }
  func.func @transform_2(%arg0: i32) -> (i32, i32) {
    %c0_i32 = arith.constant 0 : i32
    %c0_i32_0 = arith.constant 0 : i32
    %c0_i32_1 = arith.constant 0 : i32
    return %c0_i32, %c0_i32_0 : i32, i32
  }
  func.func @transform_3(%arg0: i32) -> (i32, i32) {
    %c0_i32 = arith.constant 0 : i32
    %c0_i32_0 = arith.constant 0 : i32
    %c0_i32_1 = arith.constant 0 : i32
    return %c0_i32, %c0_i32_0 : i32, i32
  }
  func.func @transform_4(%arg0: i32) -> (i32, i32) {
    %c0_i32 = arith.constant 0 : i32
    %c0_i32_0 = arith.constant 0 : i32
    %c0_i32_1 = arith.constant 0 : i32
    return %c0_i32, %c0_i32_0 : i32, i32
  }
  func.func @transform_5(%arg0: i32) -> (i32, i32) {
    %c0_i32 = arith.constant 0 : i32
    %c0_i32_0 = arith.constant 0 : i32
    %c0_i32_1 = arith.constant 0 : i32
    return %c0_i32, %c0_i32_0 : i32, i32
  }
  func.func @transform_6(%arg0: i32) -> (i32, i32) {
    %c0_i32 = arith.constant 0 : i32
    %c0_i32_0 = arith.constant 0 : i32
    %c0_i32_1 = arith.constant 0 : i32
    return %c0_i32, %c0_i32_0 : i32, i32
  }
  func.func @transform_7(%arg0: i32) -> (i32, i32) {
    %c0_i32 = arith.constant 0 : i32
    %c0_i32_0 = arith.constant 0 : i32
    return %arg0, %c0_i32 : i32, i32
  }
}

</mosaic_0001>

<bundles_post_ra>
// kernel: mlp_regression_rel.1
= control target key start
LH: loop header
LB: loop body
LE: loop exit
PB: predicated region body
PF: predicated region fallthrough
CT: control target
= control target key end

     0   :  { %vm864_vm0 = vcmask 1040384   ;;  %vm1781_vm1 = vmmov 0   ;;  %vm860_vm2 = vcmask 7168   ;;  %vm1169_vm3 = vcmask 1041408   ;;  %s2201_s1 = inlined_call_operand.vmem [shape: bf16[1537,50], index: 1, kind: input, shape index: {}]   ;;  %s2202_s0 = inlined_call_operand.vmem [shape: bf16[8,1537], index: 0, kind: input, shape index: {}]   ;;  %s2203_s3 = inlined_call_operand.vmem [shape: f32[50,50], index: 3, kind: input, shape index: {}]   ;;  %s2204_s5 = inlined_call_operand.vmem [shape: f32[50,1], index: 5, kind: input, shape index: {}]   ;;  %s2205_s2 = inlined_call_operand.vmem [shape: f32[1,50], index: 2, kind: input, shape index: {}]   ;;  %s2206_s6 = inlined_call_operand.<no memory space> [shape: f32[1,1], index: 6, kind: input, shape index: {}]   ;;  %s2207_s4 = inlined_call_operand.vmem [shape: f32[1,50], index: 4, kind: input, shape index: {}]   ;;  %s2208_s7 = inlined_call_operand.vmem [shape: f32[8,1], index: 7, kind: output, shape index: {}]  }
   0x1   :  { %v1669_v0 = vld [vmem:[%s2201_s1 + $0x40] sm:$0xff]   ;;  %v1673_v4 = vld [vmem:[%s2201_s1 + $0x48] sm:$0xff]   ;;  %v1677_v8 = vld [vmem:[%s2201_s1 + $0x50] sm:$0xff]   ;;  %vm1165_vm4 = vcmask 408576  }
   0x2   :  { %v1670_v1 = vld [vmem:[%s2201_s1] sm:$0xff]   ;;  %1457 = vmatprep.subr.bf16.mxu0 %v1669_v0  ;;  %v1674_v5 = vld [vmem:[%s2201_s1 + $0x8] sm:$0xff]   ;;  %v1678_v9 = vld [vmem:[%s2201_s1 + $0x10] sm:$0xff]  }
   0x3   :  { %v1671_v2 = vld [vmem:[%s2201_s1 + $0xc0] sm:$0xff]   ;;  %1458 = vmatpush3.bf16.msra.mxu0 %v1670_v1  ;;  %v1675_v6 = vld [vmem:[%s2201_s1 + $0xc8] sm:$0xff]   ;;  %v1679_v10 = vld [vmem:[%s2201_s1 + $0xd0] sm:$0xff]  }
   0x4   :  { %v1672_v3 = vld [vmem:[%s2201_s1 + $0x80] sm:$0xff]   ;;  %1479 = vmatprep.subr.bf16.mxu1 %v1671_v2  ;;  %1459 = vmatprep.subr.bf16.mxu0 %v1673_v4  ;;  %v1676_v7 = vld [vmem:[%s2201_s1 + $0x88] sm:$0xff]   ;;  %v1680_v11 = vld [vmem:[%s2201_s1 + $0x90] sm:$0xff]  }
   0x5   :  { %1480 = vmatpush3.bf16.msra.mxu1 %v1672_v3  ;;  %v1681_v12 = vld [vmem:[%s2201_s1 + $0x58] sm:$0xff]   ;;  %v1685_v16 = vld [vmem:[%s2201_s1 + $0x60] sm:$0xff]   ;;  %v1689_v20 = vld [vmem:[%s2201_s1 + $0x68] sm:$0xff]  }
   0x6   :  { %1481 = vmatprep.subr.bf16.mxu1 %v1675_v6  ;;  %v1682_v13 = vld [vmem:[%s2201_s1 + $0x18] sm:$0xff]   ;;  %v1686_v17 = vld [vmem:[%s2201_s1 + $0x20] sm:$0xff]   ;;  %v1690_v21 = vld [vmem:[%s2201_s1 + $0x28] sm:$0xff]  }
   0x7   :  { %1460 = vmatpush3.bf16.msra.mxu0 %v1674_v5  ;;  %v1683_v14 = vld [vmem:[%s2201_s1 + $0xd8] sm:$0xff]   ;;  %v1687_v18 = vld [vmem:[%s2201_s1 + $0xe0] sm:$0xff]   ;;  %v1691_v22 = vld [vmem:[%s2201_s1 + $0xe8] sm:$0xff]  }
   0x8   :  { %1461 = vmatprep.subr.bf16.mxu0 %v1677_v8  ;;  %v1684_v15 = vld [vmem:[%s2201_s1 + $0x98] sm:$0xff]   ;;  %v1688_v19 = vld [vmem:[%s2201_s1 + $0xa0] sm:$0xff]   ;;  %v1692_v23 = vld [vmem:[%s2201_s1 + $0xa8] sm:$0xff]  }
   0x9   :  { %1482 = vmatpush3.bf16.msra.mxu1 %v1676_v7  ;;  %v1693_v24 = vld [vmem:[%s2201_s1 + $0x70] sm:$0xff]   ;;  %v1697_v28 = vld [vmem:[%s2201_s1 + $0x78] sm:$0xff]   ;;  %v29_v32 = vld [vmem:[%s2202_s0] sm:$0xff] }
   0xa   :  { %1483 = vmatprep.subr.bf16.mxu1 %v1679_v10  ;;  %v1694_v25 = vld [vmem:[%s2201_s1 + $0x30] sm:$0xff]   ;;  %v1698_v29 = vld [vmem:[%s2201_s1 + $0x38] sm:$0xff]   ;;  %v1340_v33 = vcombine.low %v29_v32, %v29_v32  ;;  %v1341_v34 = vcombine.high %v29_v32, %v29_v32  ;;  %v1703_v35 = vld [vmem:[%s2201_s1 + $0x140] sm:$0xff]  }
   0xb   :  { %1462 = vmatpush3.bf16.msra.mxu0 %v1678_v9  ;;  %v1695_v26 = vld [vmem:[%s2201_s1 + $0xf0] sm:$0xff]   ;;  %v1699_v30 = vld [vmem:[%s2201_s1 + $0xf8] sm:$0xff]   ;;  %v30_v36 = vld [vmem:[%s2202_s0 + $0x8] sm:$0xff] }
   0xc   :  { %1463 = vmatprep.subr.bf16.mxu0 %v1681_v12  ;;  %v1696_v27 = vld [vmem:[%s2201_s1 + $0xb0] sm:$0xff]   ;;  %v1700_v31 = vld [vmem:[%s2201_s1 + $0xb8] sm:$0xff]   ;;  %v1342_v37 = vcombine.low %v30_v36, %v30_v36  ;;  %v1343_v38 = vcombine.high %v30_v36, %v30_v36  ;;  %v1706_v39 = vld [vmem:[%s2201_s1 + $0x100] sm:$0xff]   ;;  %902 = vmatprep.mubr.bf16.mxu0 %v1341_v34 }
   0xd   :  { %1484 = vmatpush3.bf16.msra.mxu1 %v1680_v11  ;;  %v1707_v40 = vld [vmem:[%s2201_s1 + $0x1c0] sm:$0xff]   ;;  %v1709_v42 = vld [vmem:[%s2201_s1 + $0x148] sm:$0xff]   ;;  %v1713_v46 = vld [vmem:[%s2201_s1 + $0x150] sm:$0xff]  }
   0xe   :  { %1485 = vmatprep.subr.bf16.mxu1 %v1683_v14  ;;  %942 = vmatprep.mubr.bf16.mxu1 %v1343_v38  ;;  %v1708_v41 = vld [vmem:[%s2201_s1 + $0x180] sm:$0xff]   ;;  %v1710_v43 = vld [vmem:[%s2201_s1 + $0x108] sm:$0xff]   ;;  %v1714_v47 = vld [vmem:[%s2201_s1 + $0x110] sm:$0xff]  }
   0xf   :  { %1464 = vmatpush3.bf16.msra.mxu0 %v1682_v13  ;;  %v1711_v44 = vld [vmem:[%s2201_s1 + $0x1c8] sm:$0xff]   ;;  %v1715_v48 = vld [vmem:[%s2201_s1 + $0x1d0] sm:$0xff]   ;;  %v1717_v50 = vld [vmem:[%s2201_s1 + $0x158] sm:$0xff]  }
  0x10   :  { %1465 = vmatprep.subr.bf16.mxu0 %v1685_v16  ;;  %v1712_v45 = vld [vmem:[%s2201_s1 + $0x188] sm:$0xff]   ;;  %v1716_v49 = vld [vmem:[%s2201_s1 + $0x190] sm:$0xff]   ;;  %v1718_v51 = vld [vmem:[%s2201_s1 + $0x118] sm:$0xff]  }
  0x11   :  { %1486 = vmatpush3.bf16.msra.mxu1 %v1684_v15  ;;  %v1719_v52 = vld [vmem:[%s2201_s1 + $0x1d8] sm:$0xff]   ;;  %v1721_v54 = vld [vmem:[%s2201_s1 + $0x160] sm:$0xff]   ;;  %v1725_v58 = vld [vmem:[%s2201_s1 + $0x168] sm:$0xff]  }
  0x12   :  { %1487 = vmatprep.subr.bf16.mxu1 %v1687_v18  ;;  %v1720_v53 = vld [vmem:[%s2201_s1 + $0x198] sm:$0xff]   ;;  %v1722_v55 = vld [vmem:[%s2201_s1 + $0x120] sm:$0xff]   ;;  %v1726_v59 = vld [vmem:[%s2201_s1 + $0x128] sm:$0xff]  }
  0x13   :  { %1466 = vmatpush3.bf16.msra.mxu0 %v1686_v17  ;;  %v1723_v56 = vld [vmem:[%s2201_s1 + $0x1e0] sm:$0xff]   ;;  %v1727_v60 = vld [vmem:[%s2201_s1 + $0x1e8] sm:$0xff]   ;;  %v1729_v62 = vld [vmem:[%s2201_s1 + $0x170] sm:$0xff]  }
  0x14   :  { %1467 = vmatprep.subr.bf16.mxu0 %v1689_v20  ;;  %v1724_v57 = vld [vmem:[%s2201_s1 + $0x1a0] sm:$0xff]   ;;  %v1728_v61 = vld [vmem:[%s2201_s1 + $0x1a8] sm:$0xff]   ;;  %v1730_v63 = vld [vmem:[%s2201_s1 + $0x130] sm:$0xff]  }
  0x15   :  { %1488 = vmatpush3.bf16.msra.mxu1 %v1688_v19  ;;  %v1731_v0 = vld [vmem:[%s2201_s1 + $0x1f0] sm:$0xff]   ;;  %v1733_v2 = vld [vmem:[%s2201_s1 + $0x178] sm:$0xff]   ;;  %v1739_v9 = vld [vmem:[%s2201_s1 + $0x240] sm:$0xff]  }
  0x16   :  { %1489 = vmatprep.subr.bf16.mxu1 %v1691_v22  ;;  %v1732_v1 = vld [vmem:[%s2201_s1 + $0x1b0] sm:$0xff]   ;;  %v1734_v3 = vld [vmem:[%s2201_s1 + $0x138] sm:$0xff]   ;;  %v1742_v13 = vld [vmem:[%s2201_s1 + $0x200] sm:$0xff]  }
  0x17   :  { %1468 = vmatpush3.bf16.msra.mxu0 %v1690_v21  ;;  %v1735_v4 = vld [vmem:[%s2201_s1 + $0x1f8] sm:$0xff]   ;;  %v31_v6 = vld [vmem:[%s2202_s0 + $0x10] sm:$0xff]  ;;  %v1743_v14 = vld [vmem:[%s2201_s1 + $0x2c0] sm:$0xff]  }
  0x18   :  { %1469 = vmatprep.subr.bf16.mxu0 %v1693_v24  ;;  %v1736_v5 = vld [vmem:[%s2201_s1 + $0x1b8] sm:$0xff]   ;;  %v1344_v7 = vcombine.low %v31_v6, %v31_v6  ;;  %v1345_v8 = vcombine.high %v31_v6, %v31_v6  ;;  %v1744_v15 = vld [vmem:[%s2201_s1 + $0x280] sm:$0xff]   ;;  %v1745_v16 = vld [vmem:[%s2201_s1 + $0x248] sm:$0xff]  }
  0x19   :  { %1490 = vmatpush3.bf16.msra.mxu1 %v1692_v23  ;;  %v32_v10 = vld [vmem:[%s2202_s0 + $0x18] sm:$0xff]  ;;  %v1746_v17 = vld [vmem:[%s2201_s1 + $0x208] sm:$0xff]   ;;  %v1749_v20 = vld [vmem:[%s2201_s1 + $0x250] sm:$0xff]  }
  0x1a   :  { %1491 = vmatprep.subr.bf16.mxu1 %v1695_v26  ;;  %v1346_v11 = vcombine.low %v32_v10, %v32_v10  ;;  %v1347_v12 = vcombine.high %v32_v10, %v32_v10  ;;  %v1747_v18 = vld [vmem:[%s2201_s1 + $0x2c8] sm:$0xff]   ;;  %v1750_v21 = vld [vmem:[%s2201_s1 + $0x210] sm:$0xff]   ;;  %v1753_v24 = vld [vmem:[%s2201_s1 + $0x258] sm:$0xff]  }
  0x1b   :  { %1470 = vmatpush3.bf16.msra.mxu0 %v1694_v25  ;;  %v1748_v19 = vld [vmem:[%s2201_s1 + $0x288] sm:$0xff]   ;;  %v1751_v22 = vld [vmem:[%s2201_s1 + $0x2d0] sm:$0xff]   ;;  %v1754_v25 = vld [vmem:[%s2201_s1 + $0x218] sm:$0xff]  }
  0x1c   :  { %1471 = vmatprep.subr.bf16.mxu0 %v1697_v28  ;;  %v1752_v23 = vld [vmem:[%s2201_s1 + $0x290] sm:$0xff]   ;;  %v1755_v26 = vld [vmem:[%s2201_s1 + $0x2d8] sm:$0xff]   ;;  %v1757_v28 = vld [vmem:[%s2201_s1 + $0x260] sm:$0xff]  }
  0x1d   :  { %1492 = vmatpush3.bf16.msra.mxu1 %v1696_v27  ;;  %v1756_v27 = vld [vmem:[%s2201_s1 + $0x298] sm:$0xff]   ;;  %v1761_v32 = vld [vmem:[%s2201_s1 + $0x268] sm:$0xff]   ;;  %v1765_v36 = vld [vmem:[%s2201_s1 + $0x270] sm:$0xff]  }
  0x1e   :  { %1493 = vmatprep.subr.bf16.mxu1 %v1699_v30  ;;  %v1759_v30 = vld [vmem:[%s2201_s1 + $0x2e0] sm:$0xff]   ;;  %v1763_v34 = vld [vmem:[%s2201_s1 + $0x2e8] sm:$0xff]   ;;  %v1767_v38 = vld [vmem:[%s2201_s1 + $0x2f0] sm:$0xff]  }
  0x1f   :  { %1472 = vmatpush3.bf16.msra.mxu0 %v1698_v29  ;;  %v1758_v29 = vld [vmem:[%s2201_s1 + $0x220] sm:$0xff]  }
  0x20   :  { %1501 = vmatprep.subr.bf16.mxu0 %v1703_v35  ;;  %v1764_v35 = vld [vmem:[%s2201_s1 + $0x2a8] sm:$0xff]   ;;  %v1339_v10 = vld [vmem:[%s2205_s2] ss:$0 sm:$0xff] }
  0x21   :  { %1494 = vmatpush3.bf16.msra.mxu1 %v1700_v31  ;;  %v1760_v31 = vld [vmem:[%s2201_s1 + $0x2a0] sm:$0xff]  }
  0x22   :  { %903 = vmatmul.mubr.bf16.vlgmr.msra.gmra.mrb[0].mxu0 %v1340_v33  ;;  %1523 = vmatprep.subr.bf16.mxu1 %v1707_v40  ;;  %v1762_v33 = vld [vmem:[%s2201_s1 + $0x228] sm:$0xff]   ;;  %v1769_v40 = vld [vmem:[%s2201_s1 + $0x278] sm:$0xff]  }
  0x23   :  { %1502 = vmatpush3.bf16.msra.mxu0 %v1706_v39  ;;  %982 = vmatprep.mubr.bf16.mxu0 %v1345_v8  ;;  %v1768_v39 = vld [vmem:[%s2201_s1 + $0x2b0] sm:$0xff]  }
  0x24   :  { %943 = vmatmul.mubr.bf16.vlgmr.msra.gmra.mrb[0].mxu1 %v1342_v37  ;;  %1503 = vmatprep.subr.bf16.mxu0 %v1709_v42  ;;  %v1766_v37 = vld [vmem:[%s2201_s1 + $0x230] sm:$0xff]   ;;  %v1771_v42 = vld [vmem:[%s2201_s1 + $0x2f8] sm:$0xff]  }
  0x25   :  { %1524 = vmatpush3.bf16.msra.mxu1 %v1708_v41  ;;  %1022 = vmatprep.mubr.bf16.mxu1 %v1347_v12  ;;  %v1770_v41 = vld [vmem:[%s2201_s1 + $0x238] sm:$0xff]  }
  0x26   :  { %1525 = vmatprep.subr.bf16.mxu1 %v1711_v44  ;;  %v33_v44 = vld [vmem:[%s2202_s0 + $0x20] sm:$0xff] }
  0x27   :  { %1504 = vmatpush3.bf16.msra.mxu0 %v1710_v43  ;;  %v1772_v43 = vld [vmem:[%s2201_s1 + $0x2b8] sm:$0xff]  }
  0x28   :  { %1505 = vmatprep.subr.bf16.mxu0 %v1713_v46  ;;  %v1779_v46 = vmov 0  }
  0x29   :  { %1526 = vmatpush3.bf16.msra.mxu1 %v1712_v45  ;;  %v34_v45 = vld [vmem:[%s2202_s0 + $0x28] sm:$0xff] }
  0x2a   :  { %1527 = vmatprep.subr.bf16.mxu1 %v1715_v48  ;;  %v1348_v48 = vcombine.low %v33_v44, %v33_v44 }
  0x2b   :  { %1506 = vmatpush3.bf16.msra.mxu0 %v1714_v47  ;;  %v866_v47 = vsel %vm864_vm0, 65535, %v1779_v46 }
  0x2c   :  { %1507 = vmatprep.subr.bf16.mxu0 %v1717_v50  ;;  %v1350_v50 = vcombine.low %v34_v45, %v34_v45 }
  0x2d   :  { %1528 = vmatpush3.bf16.msra.mxu1 %v1716_v49  ;;  %v1349_v49 = vcombine.high %v33_v44, %v33_v44 }
  0x2e   :  { %1529 = vmatprep.subr.bf16.mxu1 %v1719_v52  ;;  %v1777_v52 = vld [vmem:[%s2201_s1 + $0x300] ss:$0 sps:$4 sm:$0x11]  }
  0x2f   :  { %1508 = vmatpush3.bf16.msra.mxu0 %v1718_v51  ;;  %v1351_v51 = vcombine.high %v34_v45, %v34_v45 }
  0x30   :  { %1509 = vmatprep.subr.bf16.mxu0 %v1721_v54  ;;  %v868_v54 = vand.u32 %v1777_v52, %v866_v47  ;;  %v1248_v52 = vld [vmem:[%s2204_s5 + $0x20] sm:$0xff] }
  0x31   :  { %1530 = vmatpush3.bf16.msra.mxu1 %v1720_v53  ;;  %v1780_v53 = vmov 0.0  }
  0x32   :  { %1531 = vmatprep.subr.bf16.mxu1 %v1723_v56  ;;  %v1782_v56 = vmov 0.0|0.0  }
  0x33   :  { %1510 = vmatpush3.bf16.msra.mxu0 %v1722_v55  ;;  %v1778_v55 = vld [vmem:[%s2202_s0 + $0x30] ss:$0 sps:$4 sm:$0xff]  }
  0x34   :  { %1511 = vmatprep.subr.bf16.mxu0 %v1725_v58  ;;  %v1152_v58 = vld [vmem:[%s2203_s3 + $0x8] sm:$0xff] }
  0x35   :  { %1532 = vmatpush3.bf16.msra.mxu1 %v1724_v57  ;;  %v1151_v57 = vld [vmem:[%s2203_s3] sm:$0xff] }
  0x36   :  { %1533 = vmatprep.subr.bf16.mxu1 %v1727_v60  ;;  %v1153_v60 = vld [vmem:[%s2203_s3 + $0x10] sm:$0xff] }
  0x37   :  { %1512 = vmatpush3.bf16.msra.mxu0 %v1726_v59  ;;  %v1648_v59 = vpack.c.bf16 %v1152_v58, %v1151_v57  ;;  %v12_v57 = vstv %s2206_s6  ;;  %v1451_v58 = vld [vmem:[%s2207_s4] ss:$0 sm:$0xff] }
  0x38   :  { %1513 = vmatprep.subr.bf16.mxu0 %v1729_v62  ;;  %13 = vst [vmem:[#allocation2] sm:$0x1] %v12_v57 }
  0x39   :  { %1534 = vmatpush3.bf16.msra.mxu1 %v1728_v61  ;;  %v1154_v61 = vld [vmem:[%s2203_s3 + $0x18] sm:$0xff] }
  0x3a   :  { %1535 = vmatprep.subr.bf16.mxu1 %v1731_v0  ;;  %v1651_v62 = vpack.c.bf16 %v1154_v61, %v1153_v60  ;;  %v1156_v0 = vld [vmem:[%s2203_s3 + $0x28] sm:$0xff] }
  0x3b   :  { %1514 = vmatpush3.bf16.msra.mxu0 %v1730_v63  ;;  %v1155_v63 = vld [vmem:[%s2203_s3 + $0x20] sm:$0xff] }
  0x3c   :  { %1515 = vmatprep.subr.bf16.mxu0 %v1733_v2  ;;  %v1157_v2 = vld [vmem:[%s2203_s3 + $0x30] sm:$0x3] }
  0x3d   :  { %1536 = vmatpush3.bf16.msra.mxu1 %v1732_v1  ;;  %v1654_v1 = vpack.c.bf16 %v1156_v0, %v1155_v63 }
  0x3e   :  { %1537 = vmatprep.subr.bf16.mxu1 %v1735_v4  ;;  %v1245_v4 = vld [vmem:[%s2204_s5 + $0x8] sm:$0xff] }
  0x3f   :  { %1516 = vmatpush3.bf16.msra.mxu0 %v1734_v3  ;;  %v1244_v3 = vld [vmem:[%s2204_s5] sm:$0xff] }
  0x40   :  { %1545 = vmatprep.subr.bf16.mxu0 %v1739_v9  ;;  %v1657_v6 = vpack.c.bf16 %v1245_v4, %v1244_v3 }
  0x41   :  { %1538 = vmatpush3.bf16.msra.mxu1 %v1736_v5  ;;  %v1246_v5 = vld [vmem:[%s2204_s5 + $0x10] sm:$0xff] }
  0x42   :  { %983 = vmatmul.mubr.bf16.vlgmr.msra.gmra.mrb[4].mxu0 %v1344_v7  ;;  %1567 = vmatprep.subr.bf16.mxu1 %v1743_v14  ;;  %v1247_v7 = vld [vmem:[%s2204_s5 + $0x18] sm:$0xff] }
  0x43   :  { %1546 = vmatpush3.bf16.msra.mxu0 %v1742_v13  ;;  %1062 = vmatprep.mubr.bf16.mxu0 %v1349_v49  ;;  %v1660_v8 = vpack.c.bf16 %v1247_v7, %v1246_v5 }
  0x44   :  { %1023 = vmatmul.mubr.bf16.vlgmr.msra.gmra.mrb[4].mxu1 %v1346_v11  ;;  %1547 = vmatprep.subr.bf16.mxu0 %v1745_v16 }
  0x45   :  { %1568 = vmatpush3.bf16.msra.mxu1 %v1744_v15  ;;  %1102 = vmatprep.mubr.bf16.mxu1 %v1351_v51 }
  0x46   :  { %1569 = vmatprep.subr.bf16.mxu1 %v1747_v18 }
  0x47   :  { %1548 = vmatpush3.bf16.msra.mxu0 %v1746_v17 }
  0x48   :  { %1549 = vmatprep.subr.bf16.mxu0 %v1749_v20 }
  0x49   :  { %1570 = vmatpush3.bf16.msra.mxu1 %v1748_v19 }
  0x4a   :  { %1571 = vmatprep.subr.bf16.mxu1 %v1751_v22 }
  0x4b   :  { %1550 = vmatpush3.bf16.msra.mxu0 %v1750_v21 }
  0x4c   :  { %1551 = vmatprep.subr.bf16.mxu0 %v1753_v24 }
  0x4d   :  { %1572 = vmatpush3.bf16.msra.mxu1 %v1752_v23 }
  0x4e   :  { %1573 = vmatprep.subr.bf16.mxu1 %v1755_v26 }
  0x4f   :  { %1552 = vmatpush3.bf16.msra.mxu0 %v1754_v25 }
  0x50   :  { %1553 = vmatprep.subr.bf16.mxu0 %v1757_v28 }
  0x51   :  { %1574 = vmatpush3.bf16.msra.mxu1 %v1756_v27 }
  0x52   :  { %1575 = vmatprep.subr.bf16.mxu1 %v1759_v30 }
  0x53   :  { %1554 = vmatpush3.bf16.msra.mxu0 %v1758_v29 }
  0x54   :  { %1555 = vmatprep.subr.bf16.mxu0 %v1761_v32 }
  0x55   :  { %1576 = vmatpush3.bf16.msra.mxu1 %v1760_v31 }
  0x56   :  { %1577 = vmatprep.subr.bf16.mxu1 %v1763_v34 }
  0x57   :  { %1556 = vmatpush3.bf16.msra.mxu0 %v1762_v33 }
  0x58   :  { %1557 = vmatprep.subr.bf16.mxu0 %v1765_v36 }
  0x59   :  { %1578 = vmatpush3.bf16.msra.mxu1 %v1764_v35 }
  0x5a   :  { %1579 = vmatprep.subr.bf16.mxu1 %v1767_v38 }
  0x5b   :  { %1558 = vmatpush3.bf16.msra.mxu0 %v1766_v37 }
  0x5c   :  { %1559 = vmatprep.subr.bf16.mxu0 %v1769_v40 }
  0x5d   :  { %1580 = vmatpush3.bf16.msra.mxu1 %v1768_v39 }
  0x5e   :  { %1581 = vmatprep.subr.bf16.mxu1 %v1771_v42 }
  0x5f   :  { %1560 = vmatpush3.bf16.msra.mxu0 %v1770_v41 }
  0x60   :  { %1607 = vmatprep.subr.bf16.mxu0 %v1780_v53 }
  0x61   :  { %1582 = vmatpush3.bf16.msra.mxu1 %v1772_v43 }
  0x62   :  { %1063 = vmatmul.mubr.bf16.vlgmr.msra.gmra.mrb[8].mxu0 %v1348_v48  ;;  %1647 = vmatprep.subr.bf16.mxu1 %v1782_v56 }
  0x63   :  { %1608 = vmatpush3.bf16.msra.mxu0 %v868_v54  ;;  %1609 = vmatprep.mubr.msk.bf16.mxu0 %vm1781_vm1, %v1780_v53  ;;  %v1249_v54 = vld [vmem:[%s2204_s5 + $0x28] sm:$0xff] }
  0x64   :  { %1103 = vmatmul.mubr.bf16.vlgmr.msra.gmra.mrb[8].mxu1 %v1350_v50  ;;  %1656 = vmatprep.subr.bf16.mxu0 %v1782_v56 }
  0x65   :  { %1627 = vmatprep.mubr.msk.f32.mxu1 %vm1781_vm1, %v1780_v53  ;;  %1649 = vmatpush3.bf16.msra.mxu1 %v1648_v59 }
  0x66   :  { %1650 = vmatprep.subr.bf16.mxu1 %v1782_v56 }
  0x69   :  { %1652 = vmatpush3.bf16.msra.mxu1 %v1651_v62 }
  0x6a   :  { %1610 = vmatmul.mubr.msk.bf16.vlgmr.msra.gmra.mrb[12].mxu0 %vm860_vm2, %v1778_v55  ;;  %1653 = vmatprep.subr.bf16.mxu1 %v1782_v56  ;;  %v1663_v55 = vpack.c.bf16 %v1249_v54, %v1248_v52 }
  0x6b   :  { %1644 = vmatprep.mubr.msk.f32.mxu0 %vm1781_vm1, %v1780_v53  ;;  %1658 = vmatpush3.bf16.msra.mxu0 %v1657_v6 }
  0x6c   :  { %1659 = vmatprep.subr.bf16.mxu0 %v1782_v56 }
  0x6d   :  { %1655 = vmatpush3.bf16.msra.mxu1 %v1654_v1 }
  0x6e   :  { %1625 = vmatprep.subr.mxu1 %v1780_v53 }
  0x6f   :  { %1661 = vmatpush3.bf16.msra.mxu0 %v1660_v8 }
  0x70   :  { %1662 = vmatprep.subr.bf16.mxu0 %v1782_v56  ;;  %v1250_v56 = vld [vmem:[%s2204_s5 + $0x30] sm:$0x3] }
  0x71   :  { %1626 = vmatpush3.msk.msra.mxu1 %vm1169_vm3, %v1157_v2 }
  0x73   :  { %1664 = vmatpush3.bf16.msra.mxu0 %v1663_v55 }
  0x74   :  { %1642 = vmatprep.subr.mxu0 %v1780_v53  ;;  %v1454_v53 = vld [vmem:[#allocation2] ss:$0 sm:$0xff] }
  0x77   :  { %1643 = vmatpush3.msk.msra.mxu0 %vm1169_vm3, %v1250_v56 }
  0xf5   :  { %v1473_v9 = vpop.f32.mrb[0].mxu0 }
  0xf6   :  { %v1474_v11 = vpop.f32.mrb[1].mxu0 }
  0xf7   :  { %v1475_v12 = vadd.f32 %v1474_v11, %v1473_v9  ;;  %v1476_v13 = vpop.f32.mrb[2].mxu0  ;;  %v1495_v14 = vpop.f32.mrb[0].mxu1 }
  0xf8   :  { %v1477_v15 = vpop.f32.mrb[3].mxu0  ;;  %v1496_v16 = vpop.f32.mrb[1].mxu1 }
  0xf9   :  { %v905_v17 = vadd.f32 %v1475_v12, %v1339_v10  ;;  %v1497_v18 = vadd.f32 %v1496_v16, %v1495_v14  ;;  %v1498_v19 = vpop.f32.mrb[2].mxu1 }
  0xfa   :  { %v1499_v20 = vpop.f32.mrb[3].mxu1 }
  0xfb   :  { %v945_v21 = vadd.f32 %v1497_v18, %v905_v17 }
 0x115   :  { %v1517_v22 = vpop.f32.mrb[4].mxu0 }
 0x116   :  { %v1518_v23 = vpop.f32.mrb[5].mxu0 }
 0x117   :  { %v1519_v24 = vadd.f32 %v1518_v23, %v1517_v22  ;;  %v1520_v25 = vpop.f32.mrb[6].mxu0  ;;  %v1539_v26 = vpop.f32.mrb[4].mxu1 }
 0x118   :  { %v1521_v27 = vpop.f32.mrb[7].mxu0  ;;  %v1540_v28 = vpop.f32.mrb[5].mxu1 }
 0x119   :  { %v985_v29 = vadd.f32 %v1519_v24, %v945_v21  ;;  %v1541_v30 = vadd.f32 %v1540_v28, %v1539_v26  ;;  %v1542_v31 = vpop.f32.mrb[6].mxu1 }
 0x11a   :  { %v1543_v32 = vpop.f32.mrb[7].mxu1 }
 0x11b   :  { %v1025_v33 = vadd.f32 %v1541_v30, %v985_v29 }
 0x135   :  { %v1561_v34 = vpop.f32.mrb[8].mxu0 }
 0x136   :  { %v1562_v35 = vpop.f32.mrb[9].mxu0 }
 0x137   :  { %v1583_v36 = vpop.f32.mrb[8].mxu1  ;;  %v1563_v37 = vadd.f32 %v1562_v35, %v1561_v34  ;;  %v1564_v38 = vpop.f32.mrb[10].mxu0 }
 0x138   :  { %v1584_v39 = vpop.f32.mrb[9].mxu1  ;;  %v1565_v41 = vpop.f32.mrb[11].mxu0 }
 0x139   :  { %v1585_v40 = vadd.f32 %v1584_v39, %v1583_v36  ;;  %v1586_v42 = vpop.f32.mrb[10].mxu1  ;;  %v1065_v43 = vadd.f32 %v1563_v37, %v1025_v33 }
 0x13a   :  { %v1587_v44 = vpop.f32.mrb[11].mxu1 }
 0x13b   :  { %v1105_v45 = vadd.f32 %v1585_v40, %v1065_v43 }
 0x13d   :  { %v1144_v46 = vpop.f32.mrb[12].mxu0 }
 0x13e   :  { %v1145_v47 = vadd.f32 %v1144_v46, %v1105_v45  ;;  %v1611_v48 = vpop.f32.mrb[13].mxu0 }
 0x13f   :  { %v1147_v49 = vpop.f32.mrb[14].mxu0 }
 0x140   :  { %v1150_v50 = vmax.f32 %v1145_v47, 0.0  ;;  %v1612_v51 = vpop.f32.mrb[15].mxu0 }
 0x142   :  { %1628 = vmatmul.mubr.msk.f32.vlgmr.msra.gmra.mrb[12].mxu1 %vm1165_vm4, %v1150_v50 }
 0x215   :  { %v1239_v59 = vpop.f32.mrb[12].mxu1 }
 0x216   :  { %v1240_v60 = vadd.f32 %v1451_v58, %v1239_v59  ;;  %v1629_v61 = vpop.f32.mrb[13].mxu1 }
 0x218   :  { %v1243_v62 = vmax.f32 %v1240_v60, 0.0 }
 0x21a   :  { %1645 = vmatmul.mubr.msk.f32.vlgmr.msra.gmra.mrb[16].mxu0 %vm1165_vm4, %v1243_v62 }
 0x2ed   :  { %v1330_v63 = vpop.f32.mrb[16].mxu0 }
 0x2ee   :  { %v1331_v0 = vadd.f32 %v1454_v53, %v1330_v63  ;;  %v1646_v1 = vpop.f32.mrb[17].mxu0 }
 0x2f0   :  { %1334 = vst.msk [vmem:[%s2208_s7] sm:$0xff] %vm860_vm2, %v1331_v0 }

</bundles_post_ra>
